<compile_context>
chip_gen: v7x
topology: tpu7x:2x2x1
jax: 0.10.0
libtpu: 0.0.40
codegen_flags: <defaults>
</compile_context>

<pallas_src>
import functools

import jax
import jax.numpy as jnp
import numpy as np
from jax.experimental import pallas as pl
from jax.experimental.pallas import tpu as pltpu

_LANE = 128     # vreg lane width (last dim)
_SUBLANE = 8    # f32/bf16-safe sublane granularity (second-to-last dim)
_VMEM_BUDGET = 48 << 20   # conservative: fits v7x's 64 MiB/TC with headroom


def _round_up(n, m):
    return ((n + m - 1) // m) * m


# ----------------------------------------------------------------------------
# Kernel
# ----------------------------------------------------------------------------
def _mlp_kernel(n_layers, x_ref, *refs):
    """refs = (w0, b0, w1, b1, ..., w_{L-1}, b_{L-1}, out_ref).

    Hidden layers: Linear + ReLU (hidden_nonlinearity=F.relu); output layer is
    linear (output_nonlinearity=None); layer_normalization=False.
    Weights and activations are bf16 MXU operands; accumulation, bias add and
    ReLU happen in f32; activations are re-cast to bf16 between layers.
    """
    out_ref = refs[-1]
    wb = refs[:-1]

    h = x_ref[...]                                     # (TILE_B, D0p) bf16
    for layer_idx in range(n_layers):
        w = wb[2 * layer_idx][...]                     # (Dlp, D{l+1}p) bf16
        b = wb[2 * layer_idx + 1][...]                 # (1, D{l+1}p) f32
        acc = jnp.dot(h, w, preferred_element_type=jnp.float32) + b
        if layer_idx < n_layers - 1:
            h = jnp.maximum(acc, 0.0).astype(jnp.bfloat16)   # ReLU in f32, carry bf16
        else:
            out_ref[...] = acc.astype(out_ref.dtype)


# ----------------------------------------------------------------------------
# One-time parameter preparation (hoisted out of the per-call hot path)
# ----------------------------------------------------------------------------
def prepare_mlp_params(params, *, feature_align=_LANE):
    """Pad feature dims to `feature_align` lanes, cast weights to bf16 — once.

    params: list of (W, b); W shape (in, out), b shape (out,) or (1, out).
    Returns (weights, biases, in_dim, out_dim) with padded device arrays.
    Use feature_align=256 for wide, MXU-bound layers on v6e/v7x.
    """
    dims = [params[0][0].shape[0]] + [w.shape[1] for (w, _) in params]
    pdims = [_round_up(d, feature_align) for d in dims]
    weights, biases = [], []
    for i, (w, b) in enumerate(params):
        wp = jnp.zeros((pdims[i], pdims[i + 1]), jnp.bfloat16)
        wp = wp.at[: w.shape[0], : w.shape[1]].set(jnp.asarray(w, jnp.bfloat16))
        bv = jnp.asarray(b, jnp.float32).reshape(1, -1)
        bp = jnp.zeros((1, pdims[i + 1]), jnp.float32)
        bp = bp.at[:, : bv.shape[1]].set(bv)
        weights.append(wp)
        biases.append(bp)
    return tuple(weights), tuple(biases), dims[0], dims[-1]


def _resident_spec(shape, single_buffer):
    """Constant-index-map BlockSpec; single-buffered when supported."""
    nd = len(shape)
    index_map = lambda i, _nd=nd: (0,) * _nd
    if single_buffer and hasattr(pl, "Buffered"):
        try:
            return pl.BlockSpec(shape, index_map, pipeline_mode=pl.Buffered(1))
        except TypeError:
            pass
    return pl.BlockSpec(shape, index_map)


def _auto_tile_b(B, pdims, wb_resident_bytes, out_bytes):
    """Largest sublane-multiple batch tile that fits the VMEM budget."""
    b8 = _round_up(max(B, 1), _SUBLANE)
    per_row = (2 * pdims[0] * 2                 # x tile, bf16, double-buffered
               + 2 * pdims[-1] * out_bytes      # out tile, double-buffered
               + max(pdims) * (4 + 2))          # live f32 acc + bf16 activation
    avail = _VMEM_BUDGET - wb_resident_bytes
    if avail < per_row * _SUBLANE:
        # TODO(synk): weights exceed the resident budget -> needs K-tiling.
        avail = per_row * _SUBLANE
    t = max(_SUBLANE, min(avail // per_row, 2048))
    t = (t // _SUBLANE) * _SUBLANE
    if b8 >= 2 * _SUBLANE:
        # Guarantee >= 2 grid steps: lets the "parallel" batch axis shard
        # across v7x's two TensorCores and keeps the pipeline overlapped.
        t = min(t, _round_up(-(-b8 // 2), _SUBLANE))
    return int(min(t, b8))


# ----------------------------------------------------------------------------
# Forward wrapper
# ----------------------------------------------------------------------------
def mlp_forward(x, weights, biases, *, out_dim, tile_b=None,
                out_dtype=jnp.float32, single_buffer_weights=True):
    """x: (B, ...) arbitrary trailing dims (flattened like input_val.view(B,-1)).

    weights/biases: outputs of prepare_mlp_params (padded bf16 / f32).
    """
    B = x.shape[0]
    n_layers = len(weights)
    pdims = [weights[0].shape[0]] + [w.shape[1] for w in weights]

    x2d = x.reshape(B, -1)
    in_dim = x2d.shape[1]
    assert in_dim <= pdims[0], "x feature dim exceeds prepared input width"

    out_bytes = jnp.dtype(out_dtype).itemsize
    wb_bytes = (sum(int(w.size) * 2 for w in weights)
                + sum(int(b.size) * 4 for b in biases))
    wb_resident = wb_bytes * (1 if single_buffer_weights else 2)

    if tile_b is None:
        tile_b = _auto_tile_b(B, pdims, wb_resident, out_bytes)
    tile_b = max(_SUBLANE, _round_up(int(tile_b), _SUBLANE))
    b_pad = _round_up(max(B, 1), tile_b)
    n_tiles = b_pad // tile_b

    # bf16 activation stream (lane-dense, zero-padded; exact for Linear+ReLU).
    xp = jnp.zeros((b_pad, pdims[0]), jnp.bfloat16)
    xp = xp.at[:B, :in_dim].set(x2d.astype(jnp.bfloat16))

    x_spec = pl.BlockSpec((tile_b, pdims[0]), lambda i: (i, 0))
    flat, wb_specs = [], []
    for w, b in zip(weights, biases):
        flat.extend([w, b])
        wb_specs.append(_resident_spec(w.shape, single_buffer_weights))
        wb_specs.append(_resident_spec(b.shape, single_buffer_weights))
    out_spec = pl.BlockSpec((tile_b, pdims[-1]), lambda i: (i, 0))

    # Scoped-VMEM limit from the actual footprint (defaults are 16/32 MiB).
    per_step = (2 * tile_b * pdims[0] * 2
                + 2 * tile_b * pdims[-1] * out_bytes
                + tile_b * max(pdims) * (4 + 2))
    vmem_need = wb_resident + per_step
    vmem_limit = int(min(max(vmem_need * 5 // 4 + (2 << 20), 32 << 20), 64 << 20))

    flops = 2 * b_pad * sum(pdims[i] * pdims[i + 1] for i in range(n_layers))
    bytes_accessed = int(xp.size * 2 + wb_bytes + b_pad * pdims[-1] * out_bytes)

    out_padded = pl.pallas_call(
        functools.partial(_mlp_kernel, n_layers),
        grid=(n_tiles,),
        in_specs=[x_spec] + wb_specs,
        out_specs=out_spec,
        out_shape=jax.ShapeDtypeStruct((b_pad, pdims[-1]), out_dtype),
        compiler_params=pltpu.CompilerParams(
            dimension_semantics=("parallel",),
            vmem_limit_bytes=vmem_limit),
        cost_estimate=pl.CostEstimate(
            flops=flops, transcendentals=0, bytes_accessed=bytes_accessed),
    )(xp, *flat)

    return out_padded[:B, :out_dim]


# ----------------------------------------------------------------------------
# Init + reference (matches the PyTorch module's defaults)
# ----------------------------------------------------------------------------
def init_mlp_params(key, input_dim, output_dim, hidden_sizes):
    """xavier_normal_ weights, zero biases (matches the module init)."""
    sizes = [input_dim] + list(hidden_sizes) + [output_dim]
    params = []
    for i in range(len(sizes) - 1):
        fan_in, fan_out = sizes[i], sizes[i + 1]
        key, sub = jax.random.split(key)
        std = float(np.sqrt(2.0 / (fan_in + fan_out)))   # xavier normal, gain=1
        w = jax.random.normal(sub, (fan_in, fan_out), dtype=jnp.float32) * std
        b = jnp.zeros((1, fan_out), dtype=jnp.float32)
        params.append((w, b))
    return params


def mlp_reference(x, params, weight_dtype=jnp.float32):
    """Pure-JAX reference of the PyTorch forward (optionally bf16 operands)."""
    B = x.shape[0]
    h = x.reshape(B, -1).astype(jnp.float32)
    for i, (w, b) in enumerate(params):
        h = jnp.dot(h.astype(weight_dtype), w.astype(weight_dtype),
                    preferred_element_type=jnp.float32) + b.reshape(1, -1)
        if i < len(params) - 1:
            h = jnp.maximum(h, 0.0)
    return h


if __name__ == "__main__":
    # input_val (B=2, 4, 16) -> flattened input_dim=64, hidden=(32, 32), out=8.
    key = jax.random.PRNGKey(0)
    key, xkey = jax.random.split(key)

    B, C, S = 2, 4, 16
    input_dim = C * S
    hidden_sizes = (32, 32)
    output_dim = 8

    x = jax.random.normal(xkey, (B, C, S), dtype=jnp.float32)
    params = init_mlp_params(key, input_dim, output_dim, hidden_sizes)

    # One-time parameter preparation (padding + bf16 cast) — outside the jit.
    weights, biases, _, out_dim = prepare_mlp_params(params)

    def build(single_buffer):
        return jax.jit(functools.partial(
            mlp_forward, out_dim=out_dim,
            single_buffer_weights=single_buffer))

    try:
        out = jax.block_until_ready(build(True)(x, weights, biases))
    except Exception:
        # Fallback if this JAX build rejects single-buffered weight BlockSpecs.
        out = jax.block_until_ready(build(False)(x, weights, biases))

    # Tight check vs a reference using the same bf16-operand / f32-accumulate
    # path, plus a looser sanity check vs the pure-f32 PyTorch semantics.
    ref_bf16 = mlp_reference(x, params, weight_dtype=jnp.bfloat16)
    ref_f32 = mlp_reference(x, params, weight_dtype=jnp.float32)
    np.testing.assert_allclose(np.asarray(out), np.asarray(ref_bf16),
                               rtol=5e-3, atol=5e-3)
    np.testing.assert_allclose(np.asarray(out), np.asarray(ref_f32),
                               rtol=2e-2, atol=2e-2)

    print("KERNEL_OK")
</pallas_src>

<mosaic_0001>
module attributes {stable_mosaic.version = 11 : i64} {
  func.func @_mlp_kernel(%arg0: i32, %arg1: memref<8x128xbf16, #tpu.memory_space<vmem>>, %arg2: memref<128x128xbf16, #tpu.memory_space<vmem>>, %arg3: memref<1x128xf32, #tpu.memory_space<vmem>>, %arg4: memref<128x128xbf16, #tpu.memory_space<vmem>>, %arg5: memref<1x128xf32, #tpu.memory_space<vmem>>, %arg6: memref<128x128xbf16, #tpu.memory_space<vmem>>, %arg7: memref<1x128xf32, #tpu.memory_space<vmem>>, %arg8: memref<8x128xf32, #tpu.memory_space<vmem>>) attributes {dimension_semantics = [#tpu.dimension_semantics<parallel>], iteration_bounds = array<i64: 1>, scalar_prefetch = 0 : i64, scratch_operands = 0 : i64, tpu.core_type = #tpu.core_type<tc>, window_params = [{transform_indices = @transform_0, window_bounds = array<i64: 8, 128>}, {pipeline_mode = #tpu.pipeline_mode<synchronous>, transform_indices = @transform_1, window_bounds = array<i64: 128, 128>}, {pipeline_mode = #tpu.pipeline_mode<synchronous>, transform_indices = @transform_2, window_bounds = array<i64: 1, 128>}, {pipeline_mode = #tpu.pipeline_mode<synchronous>, transform_indices = @transform_3, window_bounds = array<i64: 128, 128>}, {pipeline_mode = #tpu.pipeline_mode<synchronous>, transform_indices = @transform_4, window_bounds = array<i64: 1, 128>}, {pipeline_mode = #tpu.pipeline_mode<synchronous>, transform_indices = @transform_5, window_bounds = array<i64: 128, 128>}, {pipeline_mode = #tpu.pipeline_mode<synchronous>, transform_indices = @transform_6, window_bounds = array<i64: 1, 128>}, {transform_indices = @transform_7, window_bounds = array<i64: 8, 128>}]} {
    %c0 = arith.constant 0 : index
    %c0_0 = arith.constant 0 : index
    %0 = vector.load %arg1[%c0, %c0_0] : memref<8x128xbf16, #tpu.memory_space<vmem>>, vector<8x128xbf16>
    %c0_1 = arith.constant 0 : index
    %c0_2 = arith.constant 0 : index
    %1 = vector.load %arg2[%c0_1, %c0_2] : memref<128x128xbf16, #tpu.memory_space<vmem>>, vector<128x128xbf16>
    %c0_3 = arith.constant 0 : index
    %c0_4 = arith.constant 0 : index
    %2 = vector.load %arg3[%c0_3, %c0_4] : memref<1x128xf32, #tpu.memory_space<vmem>>, vector<1x128xf32>
    %cst = arith.constant dense<0.000000e+00> : vector<8x128xf32>
    %3 = tpu.matmul %0, %1, %cst {dimension_numbers = #tpu.dot_dimension_numbers<[1], [0], [0], [1], [0, 0, 1, 1], [], []>} : vector<8x128xbf16>, vector<128x128xbf16>, vector<8x128xf32> -> vector<8x128xf32>
    %4 = vector.broadcast %2 : vector<1x128xf32> to vector<8x128xf32>
    %5 = arith.addf %3, %4 : vector<8x128xf32>
    %cst_5 = arith.constant 0.000000e+00 : f32
    %6 = vector.broadcast %cst_5 : f32 to vector<8x128xf32>
    %7 = arith.maximumf %5, %6 : vector<8x128xf32>
    %8 = arith.truncf %7 : vector<8x128xf32> to vector<8x128xbf16>
    %c0_6 = arith.constant 0 : index
    %c0_7 = arith.constant 0 : index
    %9 = vector.load %arg4[%c0_6, %c0_7] : memref<128x128xbf16, #tpu.memory_space<vmem>>, vector<128x128xbf16>
    %c0_8 = arith.constant 0 : index
    %c0_9 = arith.constant 0 : index
    %10 = vector.load %arg5[%c0_8, %c0_9] : memref<1x128xf32, #tpu.memory_space<vmem>>, vector<1x128xf32>
    %cst_10 = arith.constant dense<0.000000e+00> : vector<8x128xf32>
    %11 = tpu.matmul %8, %9, %cst_10 {dimension_numbers = #tpu.dot_dimension_numbers<[1], [0], [0], [1], [0, 0, 1, 1], [], []>} : vector<8x128xbf16>, vector<128x128xbf16>, vector<8x128xf32> -> vector<8x128xf32>
    %12 = vector.broadcast %10 : vector<1x128xf32> to vector<8x128xf32>
    %13 = arith.addf %11, %12 : vector<8x128xf32>
    %cst_11 = arith.constant 0.000000e+00 : f32
    %14 = vector.broadcast %cst_11 : f32 to vector<8x128xf32>
    %15 = arith.maximumf %13, %14 : vector<8x128xf32>
    %16 = arith.truncf %15 : vector<8x128xf32> to vector<8x128xbf16>
    %c0_12 = arith.constant 0 : index
    %c0_13 = arith.constant 0 : index
    %17 = vector.load %arg6[%c0_12, %c0_13] : memref<128x128xbf16, #tpu.memory_space<vmem>>, vector<128x128xbf16>
    %c0_14 = arith.constant 0 : index
    %c0_15 = arith.constant 0 : index
    %18 = vector.load %arg7[%c0_14, %c0_15] : memref<1x128xf32, #tpu.memory_space<vmem>>, vector<1x128xf32>
    %cst_16 = arith.constant dense<0.000000e+00> : vector<8x128xf32>
    %19 = tpu.matmul %16, %17, %cst_16 {dimension_numbers = #tpu.dot_dimension_numbers<[1], [0], [0], [1], [0, 0, 1, 1], [], []>} : vector<8x128xbf16>, vector<128x128xbf16>, vector<8x128xf32> -> vector<8x128xf32>
    %20 = vector.broadcast %18 : vector<1x128xf32> to vector<8x128xf32>
    %21 = arith.addf %19, %20 : vector<8x128xf32>
    %c0_17 = arith.constant 0 : index
    %c0_18 = arith.constant 0 : index
    %22 = vector.load %arg8[%c0_17, %c0_18] : memref<8x128xf32, #tpu.memory_space<vmem>>, vector<8x128xf32>
    tpu.vector_store %arg8[%c0_17, %c0_18], %21 {strides = array<i32>} : memref<8x128xf32, #tpu.memory_space<vmem>>, vector<8x128xf32>,
    return
  }
  func.func @transform_0(%arg0: i32) -> (i32, i32) {
    %c0_i32 = arith.constant 0 : i32
    %c0_i32_0 = arith.constant 0 : i32
    return %arg0, %c0_i32 : i32, i32
  }
  func.func @transform_1(%arg0: i32) -> (i32, i32) {
    %c0_i32 = arith.constant 0 : i32
    %c0_i32_0 = arith.constant 0 : i32
    %c0_i32_1 = arith.constant 0 : i32
    return %c0_i32, %c0_i32_0 : i32, i32
  }
  func.func @transform_2(%arg0: i32) -> (i32, i32) {
    %c0_i32 = arith.constant 0 : i32
    %c0_i32_0 = arith.constant 0 : i32
    %c0_i32_1 = arith.constant 0 : i32
    return %c0_i32, %c0_i32_0 : i32, i32
  }
  func.func @transform_3(%arg0: i32) -> (i32, i32) {
    %c0_i32 = arith.constant 0 : i32
    %c0_i32_0 = arith.constant 0 : i32
    %c0_i32_1 = arith.constant 0 : i32
    return %c0_i32, %c0_i32_0 : i32, i32
  }
  func.func @transform_4(%arg0: i32) -> (i32, i32) {
    %c0_i32 = arith.constant 0 : i32
    %c0_i32_0 = arith.constant 0 : i32
    %c0_i32_1 = arith.constant 0 : i32
    return %c0_i32, %c0_i32_0 : i32, i32
  }
  func.func @transform_5(%arg0: i32) -> (i32, i32) {
    %c0_i32 = arith.constant 0 : i32
    %c0_i32_0 = arith.constant 0 : i32
    %c0_i32_1 = arith.constant 0 : i32
    return %c0_i32, %c0_i32_0 : i32, i32
  }
  func.func @transform_6(%arg0: i32) -> (i32, i32) {
    %c0_i32 = arith.constant 0 : i32
    %c0_i32_0 = arith.constant 0 : i32
    %c0_i32_1 = arith.constant 0 : i32
    return %c0_i32, %c0_i32_0 : i32, i32
  }
  func.func @transform_7(%arg0: i32) -> (i32, i32) {
    %c0_i32 = arith.constant 0 : i32
    %c0_i32_0 = arith.constant 0 : i32
    return %arg0, %c0_i32 : i32, i32
  }
}

module attributes {stable_mosaic.version = 11 : i64} {
  func.func @_mlp_kernel(%arg0: i32, %arg1: memref<8x128xbf16, #tpu.memory_space<vmem>>, %arg2: memref<128x128xbf16, #tpu.memory_space<vmem>>, %arg3: memref<1x128xf32, #tpu.memory_space<vmem>>, %arg4: memref<128x128xbf16, #tpu.memory_space<vmem>>, %arg5: memref<1x128xf32, #tpu.memory_space<vmem>>, %arg6: memref<128x128xbf16, #tpu.memory_space<vmem>>, %arg7: memref<1x128xf32, #tpu.memory_space<vmem>>, %arg8: memref<8x128xf32, #tpu.memory_space<vmem>>) attributes {dimension_semantics = [#tpu.dimension_semantics<parallel>], iteration_bounds = array<i64: 1>, scalar_prefetch = 0 : i64, scratch_operands = 0 : i64, tpu.core_type = #tpu.core_type<tc>, window_params = [{transform_indices = @transform_0, window_bounds = array<i64: 8, 128>}, {pipeline_mode = #tpu.pipeline_mode<synchronous>, transform_indices = @transform_1, window_bounds = array<i64: 128, 128>}, {pipeline_mode = #tpu.pipeline_mode<synchronous>, transform_indices = @transform_2, window_bounds = array<i64: 1, 128>}, {pipeline_mode = #tpu.pipeline_mode<synchronous>, transform_indices = @transform_3, window_bounds = array<i64: 128, 128>}, {pipeline_mode = #tpu.pipeline_mode<synchronous>, transform_indices = @transform_4, window_bounds = array<i64: 1, 128>}, {pipeline_mode = #tpu.pipeline_mode<synchronous>, transform_indices = @transform_5, window_bounds = array<i64: 128, 128>}, {pipeline_mode = #tpu.pipeline_mode<synchronous>, transform_indices = @transform_6, window_bounds = array<i64: 1, 128>}, {transform_indices = @transform_7, window_bounds = array<i64: 8, 128>}]} {
    %c0 = arith.constant 0 : index
    %c0_0 = arith.constant 0 : index
    %0 = vector.load %arg1[%c0, %c0_0] : memref<8x128xbf16, #tpu.memory_space<vmem>>, vector<8x128xbf16>
    %c0_1 = arith.constant 0 : index
    %c0_2 = arith.constant 0 : index
    %1 = vector.load %arg2[%c0_1, %c0_2] : memref<128x128xbf16, #tpu.memory_space<vmem>>, vector<128x128xbf16>
    %c0_3 = arith.constant 0 : index
    %c0_4 = arith.constant 0 : index
    %2 = vector.load %arg3[%c0_3, %c0_4] : memref<1x128xf32, #tpu.memory_space<vmem>>, vector<1x128xf32>
    %cst = arith.constant dense<0.000000e+00> : vector<8x128xf32>
    %3 = tpu.matmul %0, %1, %cst {dimension_numbers = #tpu.dot_dimension_numbers<[1], [0], [0], [1], [0, 0, 1, 1], [], []>} : vector<8x128xbf16>, vector<128x128xbf16>, vector<8x128xf32> -> vector<8x128xf32>
    %4 = vector.broadcast %2 : vector<1x128xf32> to vector<8x128xf32>
    %5 = arith.addf %3, %4 : vector<8x128xf32>
    %cst_5 = arith.constant 0.000000e+00 : f32
    %6 = vector.broadcast %cst_5 : f32 to vector<8x128xf32>
    %7 = arith.maximumf %5, %6 : vector<8x128xf32>
    %8 = arith.truncf %7 : vector<8x128xf32> to vector<8x128xbf16>
    %c0_6 = arith.constant 0 : index
    %c0_7 = arith.constant 0 : index
    %9 = vector.load %arg4[%c0_6, %c0_7] : memref<128x128xbf16, #tpu.memory_space<vmem>>, vector<128x128xbf16>
    %c0_8 = arith.constant 0 : index
    %c0_9 = arith.constant 0 : index
    %10 = vector.load %arg5[%c0_8, %c0_9] : memref<1x128xf32, #tpu.memory_space<vmem>>, vector<1x128xf32>
    %cst_10 = arith.constant dense<0.000000e+00> : vector<8x128xf32>
    %11 = tpu.matmul %8, %9, %cst_10 {dimension_numbers = #tpu.dot_dimension_numbers<[1], [0], [0], [1], [0, 0, 1, 1], [], []>} : vector<8x128xbf16>, vector<128x128xbf16>, vector<8x128xf32> -> vector<8x128xf32>
    %12 = vector.broadcast %10 : vector<1x128xf32> to vector<8x128xf32>
    %13 = arith.addf %11, %12 : vector<8x128xf32>
    %cst_11 = arith.constant 0.000000e+00 : f32
    %14 = vector.broadcast %cst_11 : f32 to vector<8x128xf32>
    %15 = arith.maximumf %13, %14 : vector<8x128xf32>
    %16 = arith.truncf %15 : vector<8x128xf32> to vector<8x128xbf16>
    %c0_12 = arith.constant 0 : index
    %c0_13 = arith.constant 0 : index
    %17 = vector.load %arg6[%c0_12, %c0_13] : memref<128x128xbf16, #tpu.memory_space<vmem>>, vector<128x128xbf16>
    %c0_14 = arith.constant 0 : index
    %c0_15 = arith.constant 0 : index
    %18 = vector.load %arg7[%c0_14, %c0_15] : memref<1x128xf32, #tpu.memory_space<vmem>>, vector<1x128xf32>
    %cst_16 = arith.constant dense<0.000000e+00> : vector<8x128xf32>
    %19 = tpu.matmul %16, %17, %cst_16 {dimension_numbers = #tpu.dot_dimension_numbers<[1], [0], [0], [1], [0, 0, 1, 1], [], []>} : vector<8x128xbf16>, vector<128x128xbf16>, vector<8x128xf32> -> vector<8x128xf32>
    %20 = vector.broadcast %18 : vector<1x128xf32> to vector<8x128xf32>
    %21 = arith.addf %19, %20 : vector<8x128xf32>
    %c0_17 = arith.constant 0 : index
    %c0_18 = arith.constant 0 : index
    %22 = vector.load %arg8[%c0_17, %c0_18] : memref<8x128xf32, #tpu.memory_space<vmem>>, vector<8x128xf32>
    tpu.vector_store %arg8[%c0_17, %c0_18], %21 {strides = array<i32>} : memref<8x128xf32, #tpu.memory_space<vmem>>, vector<8x128xf32>,
    return
  }
  func.func @transform_0(%arg0: i32) -> (i32, i32) {
    %c0_i32 = arith.constant 0 : i32
    %c0_i32_0 = arith.constant 0 : i32
    return %arg0, %c0_i32 : i32, i32
  }
  func.func @transform_1(%arg0: i32) -> (i32, i32) {
    %c0_i32 = arith.constant 0 : i32
    %c0_i32_0 = arith.constant 0 : i32
    %c0_i32_1 = arith.constant 0 : i32
    return %c0_i32, %c0_i32_0 : i32, i32
  }
  func.func @transform_2(%arg0: i32) -> (i32, i32) {
    %c0_i32 = arith.constant 0 : i32
    %c0_i32_0 = arith.constant 0 : i32
    %c0_i32_1 = arith.constant 0 : i32
    return %c0_i32, %c0_i32_0 : i32, i32
  }
  func.func @transform_3(%arg0: i32) -> (i32, i32) {
    %c0_i32 = arith.constant 0 : i32
    %c0_i32_0 = arith.constant 0 : i32
    %c0_i32_1 = arith.constant 0 : i32
    return %c0_i32, %c0_i32_0 : i32, i32
  }
  func.func @transform_4(%arg0: i32) -> (i32, i32) {
    %c0_i32 = arith.constant 0 : i32
    %c0_i32_0 = arith.constant 0 : i32
    %c0_i32_1 = arith.constant 0 : i32
    return %c0_i32, %c0_i32_0 : i32, i32
  }
  func.func @transform_5(%arg0: i32) -> (i32, i32) {
    %c0_i32 = arith.constant 0 : i32
    %c0_i32_0 = arith.constant 0 : i32
    %c0_i32_1 = arith.constant 0 : i32
    return %c0_i32, %c0_i32_0 : i32, i32
  }
  func.func @transform_6(%arg0: i32) -> (i32, i32) {
    %c0_i32 = arith.constant 0 : i32
    %c0_i32_0 = arith.constant 0 : i32
    %c0_i32_1 = arith.constant 0 : i32
    return %c0_i32, %c0_i32_0 : i32, i32
  }
  func.func @transform_7(%arg0: i32) -> (i32, i32) {
    %c0_i32 = arith.constant 0 : i32
    %c0_i32_0 = arith.constant 0 : i32
    return %arg0, %c0_i32 : i32, i32
  }
}

</mosaic_0001>

<bundles_post_ra>
// kernel: mlp_forward.1
= control target key start
LH: loop header
LB: loop body
LE: loop exit
PB: predicated region body
PF: predicated region fallthrough
CT: control target
= control target key end

     0   :  { %12 = vsyncpa [#allocation3], 0  ;;  %s772_s0 = inlined_call_operand.vmem [shape: bf16[8,128], index: 0, kind: input, shape index: {}]   ;;  %s773_s1 = inlined_call_operand.hbm [shape: bf16[128,128], index: 1, kind: input, shape index: {}]   ;;  %s774_s2 = inlined_call_operand.vmem [shape: f32[1,128], index: 2, kind: input, shape index: {}]   ;;  %s775_s3 = inlined_call_operand.hbm [shape: bf16[128,128], index: 3, kind: input, shape index: {}]   ;;  %s776_s4 = inlined_call_operand.vmem [shape: f32[1,128], index: 4, kind: input, shape index: {}]   ;;  %s777_s5 = inlined_call_operand.hbm [shape: bf16[128,128], index: 5, kind: input, shape index: {}]   ;;  %s778_s6 = inlined_call_operand.vmem [shape: f32[1,128], index: 6, kind: input, shape index: {}]   ;;  %s779_s7 = inlined_call_operand.vmem [shape: f32[8,128], index: 7, kind: output, shape index: {}]  }
   0x1   :  { %13 = vsyncpa [#allocation5], 0  ;;  %s628_s24 = smov [#allocation4]   ;;  %s629_s26 = smov [#allocation2]  }
   0x2   :  { %s35_s25 = sshll.u32 %s628_s24, 4  ;;  %s21_s27 = sshll.u32 %s629_s26, 4  ;;  %s36_s25 = int_to_ptr.vmem [resolvable:$true] %s35_s25  ;;  %s675_s27 = int_to_ptr.vmem [resolvable:$true] %s21_s27 }
   0x3   :  { %s558_s30 = scalar_lea.hbm %s775_s3, 1024 }
   0x4   :  { %p559_p0 = scmp.ne.s32.totalorder %s775_s3, %s558_s30  ;;  %p562_p1 = scmp.lt.u32.totalorder %s558_s30, %s775_s3 }
   0x6   :  { %p564_p2 = pnand %p562_p1, %p559_p0 }
   0x8   :  { %567 = shalt.err (!%p564_p2)
}
   0x9   :  { %s568_s12 = scalar_lea.vmem %s36_s25, 1024  ;;  %p573_p4 = scmp.lt.s32.totalorder %s36_s25, %s36_s25 }
   0xa   :  { %p569_p3 = scmp.ne.s32.totalorder %s36_s25, %s568_s12  ;;  %p574_p5 = scmp.lt.s32.totalorder %s568_s12, %s568_s12 }
   0xc   :  { %p575_p6 = por %p574_p5, %p573_p4 }
   0xe   :  { %p576_p7 = pnand %p575_p6, %p569_p3 }
  0x10   :  { %579 = shalt.err (!%p576_p7)
}
  0x11   :  { %s630_s13 = smov 64   ;;  %s631_s14 = smov 4  }
  0x12   :  { %41 = dma.hbm_to_vmem [thread:$0]  %s775_s3, 1024, %s36_s25, [#allocation5], %s630_s13, %s630_s13, %s631_s14  }
  0x13   :  { %s580_s19 = scalar_lea.hbm %s773_s1, 1024 }
  0x14   :  { %p581_p8 = scmp.ne.s32.totalorder %s773_s1, %s580_s19  ;;  %p584_p9 = scmp.lt.u32.totalorder %s580_s19, %s773_s1 }
  0x16   :  { %p586_p10 = pnand %p584_p9, %p581_p8 }
  0x18   :  { %589 = shalt.err (!%p586_p10)
}
  0x19   :  { %s590_s24 = scalar_lea.vmem %s675_s27, 1024  ;;  %p595_p12 = scmp.lt.s32.totalorder %s675_s27, %s675_s27 }
  0x1a   :  { %p591_p11 = scmp.ne.s32.totalorder %s675_s27, %s590_s24  ;;  %p596_p13 = scmp.lt.s32.totalorder %s590_s24, %s590_s24 }
  0x1c   :  { %p597_p0 = por %p596_p13, %p595_p12 }
  0x1e   :  { %p598_p1 = pnand %p597_p0, %p591_p11 }
  0x20   :  { %601 = shalt.err (!%p598_p1)
}
  0x21   :  { %27 = dma.hbm_to_vmem [thread:$0]  %s773_s1, 1024, %s675_s27, [#allocation3], %s630_s13, %s630_s13, %s631_s14  }
  0x22   :  { %s632_s26 = smov [#allocation6]   ;;  %s602_s8 = scalar_lea.hbm %s777_s5, 1024 }
  0x23   :  { %s49_s28 = sshll.u32 %s632_s26, 4  ;;  %p603_p2 = scmp.ne.s32.totalorder %s777_s5, %s602_s8  ;;  %s50_s28 = int_to_ptr.vmem [resolvable:$true] %s49_s28 }
  0x24   :  { %p606_p3 = scmp.lt.u32.totalorder %s602_s8, %s777_s5 }
  0x26   :  { %p608_p4 = pnand %p606_p3, %p603_p2 }
  0x28   :  { %611 = shalt.err (!%p608_p4)
}
  0x29   :  { %s612_s15 = scalar_lea.vmem %s50_s28, 1024  ;;  %p617_p6 = scmp.lt.s32.totalorder %s50_s28, %s50_s28 }
  0x2a   :  { %p613_p5 = scmp.ne.s32.totalorder %s50_s28, %s612_s15  ;;  %p618_p7 = scmp.lt.s32.totalorder %s612_s15, %s612_s15 }
  0x2c   :  { %p619_p8 = por %p618_p7, %p617_p6 }
  0x2e   :  { %p620_p9 = pnand %p619_p8, %p613_p5 }
  0x30   :  { %623 = shalt.err (!%p620_p9)
}
  0x31   :  { %55 = dma.hbm_to_vmem [thread:$0]  %s777_s5, 1024, %s50_s28, [#allocation5], %s630_s13, %s630_s13, %s631_s14  }
  0x32   :  { %624 = dma.done.wait [#allocation3], 1024  }
  0x33   :  { %625 = vsyncadd [#allocation3], 4294966272 }
  0x34   :  { %626 = dma.done.wait [#allocation5], 2048  }
  0x35   :  { %627 = vsyncadd [#allocation5], 4294965248  ;;  %v633_v0 = vmov 0.0   ;;  %vm634_vm0 = vmmov 0   ;;  %v534_v1 = vld [vmem:[#allocation2] sm:$0xff]   ;;  %v535_v2 = vld [vmem:[#allocation2 + $0x8] sm:$0xff]  }
  0x36   :  { %467 = vmatprep.subr.bf16.mxu0 %v633_v0  ;;  %483 = vmatprep.mubr.msk.bf16.mxu0 %vm634_vm0, %v633_v0  ;;  %v536_v3 = vld [vmem:[#allocation2 + $0x10] sm:$0xff]   ;;  %v542_v4 = vld [vmem:[#allocation4] sm:$0xff]   ;;  %v537_v5 = vld [vmem:[#allocation2 + $0x18] sm:$0xff]  }
  0x37   :  { %487 = vmatprep.subr.bf16.mxu1 %v633_v0  ;;  %503 = vmatprep.mubr.msk.bf16.mxu1 %vm634_vm0, %v633_v0  ;;  %v543_v6 = vld [vmem:[#allocation4 + $0x8] sm:$0xff]   ;;  %v538_v7 = vld [vmem:[#allocation2 + $0x20] sm:$0xff]   ;;  %v544_v8 = vld [vmem:[#allocation4 + $0x10] sm:$0xff]  }
  0x38   :  { %468 = vmatpush3.bf16.msra.mxu0 %v534_v1  ;;  %488 = vmatpush3.bf16.msra.mxu1 %v542_v4  ;;  %v539_v9 = vld [vmem:[#allocation2 + $0x28] sm:$0xff]   ;;  %v545_v10 = vld [vmem:[#allocation4 + $0x18] sm:$0xff]   ;;  %v540_v11 = vld [vmem:[#allocation2 + $0x30] sm:$0xff]  }
  0x39   :  { %469 = vmatprep.subr.bf16.mxu0 %v633_v0  ;;  %489 = vmatprep.subr.bf16.mxu1 %v633_v0  ;;  %v546_v12 = vld [vmem:[#allocation4 + $0x20] sm:$0xff]   ;;  %v541_v13 = vld [vmem:[#allocation2 + $0x38] sm:$0xff]   ;;  %v547_v14 = vld [vmem:[#allocation4 + $0x28] sm:$0xff]  }
  0x3a   :  { %v68_v15 = vld [vmem:[%s772_s0] sm:$0xf]  ;;  %v548_v16 = vld [vmem:[#allocation4 + $0x30] sm:$0xff]   ;;  %v549_v17 = vld [vmem:[#allocation4 + $0x38] sm:$0xff]  }
  0x3b   :  { %v550_v18 = vld [vmem:[#allocation6] sm:$0xff]   ;;  %v551_v19 = vld [vmem:[#allocation6 + $0x8] sm:$0xff]   ;;  %v552_v20 = vld [vmem:[#allocation6 + $0x10] sm:$0xff]  }
  0x3c   :  { %470 = vmatpush3.bf16.msra.mxu0 %v535_v2  ;;  %490 = vmatpush3.bf16.msra.mxu1 %v543_v6  ;;  %v553_v21 = vld [vmem:[#allocation6 + $0x18] sm:$0xff]   ;;  %v554_v22 = vld [vmem:[#allocation6 + $0x20] sm:$0xff]   ;;  %v555_v23 = vld [vmem:[#allocation6 + $0x28] sm:$0xff]  }
  0x3d   :  { %471 = vmatprep.subr.bf16.mxu0 %v633_v0  ;;  %491 = vmatprep.subr.bf16.mxu1 %v633_v0  ;;  %v413_v24 = vld [vmem:[%s774_s2] ss:$0 sm:$0xff]  ;;  %v556_v32 = vld [vmem:[#allocation6 + $0x30] sm:$0xff]   ;;  %v557_v33 = vld [vmem:[#allocation6 + $0x38] sm:$0xff]  }
  0x3e   :  { %v422_v34 = vld [vmem:[%s776_s4] ss:$0 sm:$0xff] }
  0x3f   :  { %v431_v42 = vld [vmem:[%s778_s6] ss:$0 sm:$0xff] }
  0x40   :  { %472 = vmatpush3.bf16.msra.mxu0 %v536_v3  ;;  %492 = vmatpush3.bf16.msra.mxu1 %v544_v8 }
  0x41   :  { %473 = vmatprep.subr.bf16.mxu0 %v633_v0  ;;  %493 = vmatprep.subr.bf16.mxu1 %v633_v0 }
  0x44   :  { %474 = vmatpush3.bf16.msra.mxu0 %v537_v5  ;;  %494 = vmatpush3.bf16.msra.mxu1 %v545_v10 }
  0x45   :  { %475 = vmatprep.subr.bf16.mxu0 %v633_v0  ;;  %495 = vmatprep.subr.bf16.mxu1 %v633_v0 }
  0x48   :  { %476 = vmatpush3.bf16.msra.mxu0 %v538_v7  ;;  %496 = vmatpush3.bf16.msra.mxu1 %v546_v12 }
  0x49   :  { %477 = vmatprep.subr.bf16.mxu0 %v633_v0  ;;  %497 = vmatprep.subr.bf16.mxu1 %v633_v0 }
  0x4c   :  { %478 = vmatpush3.bf16.msra.mxu0 %v539_v9  ;;  %498 = vmatpush3.bf16.msra.mxu1 %v547_v14 }
  0x4d   :  { %479 = vmatprep.subr.bf16.mxu0 %v633_v0  ;;  %499 = vmatprep.subr.bf16.mxu1 %v633_v0 }
  0x50   :  { %480 = vmatpush3.bf16.msra.mxu0 %v540_v11  ;;  %500 = vmatpush3.bf16.msra.mxu1 %v548_v16 }
  0x51   :  { %481 = vmatprep.subr.bf16.mxu0 %v633_v0  ;;  %501 = vmatprep.subr.bf16.mxu1 %v633_v0 }
  0x54   :  { %482 = vmatpush3.bf16.msra.mxu0 %v541_v13  ;;  %502 = vmatpush3.bf16.msra.mxu1 %v549_v17 }
  0x55   :  { %507 = vmatprep.subr.bf16.mxu0 %v633_v0 }
  0x57   :  { %484 = vmatmul.mubr.bf16.vlgmr.msra.gmra.mrb[0].mxu0 %v68_v15 }
  0x58   :  { %523 = vmatprep.mubr.msk.bf16.mxu0 %vm634_vm0, %v633_v0  ;;  %508 = vmatpush3.bf16.msra.mxu0 %v550_v18 }
  0x59   :  { %509 = vmatprep.subr.bf16.mxu0 %v633_v0 }
  0x5c   :  { %510 = vmatpush3.bf16.msra.mxu0 %v551_v19 }
  0x5d   :  { %511 = vmatprep.subr.bf16.mxu0 %v633_v0 }
  0x60   :  { %512 = vmatpush3.bf16.msra.mxu0 %v552_v20 }
  0x61   :  { %513 = vmatprep.subr.bf16.mxu0 %v633_v0 }
  0x64   :  { %514 = vmatpush3.bf16.msra.mxu0 %v553_v21 }
  0x65   :  { %515 = vmatprep.subr.bf16.mxu0 %v633_v0 }
  0x68   :  { %516 = vmatpush3.bf16.msra.mxu0 %v554_v22 }
  0x69   :  { %517 = vmatprep.subr.bf16.mxu0 %v633_v0 }
  0x6c   :  { %518 = vmatpush3.bf16.msra.mxu0 %v555_v23 }
  0x6d   :  { %519 = vmatprep.subr.bf16.mxu0 %v633_v0 }
  0x70   :  { %520 = vmatpush3.bf16.msra.mxu0 %v556_v32 }
  0x71   :  { %521 = vmatprep.subr.bf16.mxu0 %v633_v0 }
  0x74   :  { %522 = vmatpush3.bf16.msra.mxu0 %v557_v33 }
 0x12a   :  { %v174_v25 = vpop.f32.mrb[0].mxu0 }
 0x12b   :  { %v175_v26 = vadd.f32 %v413_v24, %v174_v25  ;;  %v485_v27 = vpop.f32.mrb[1].mxu0 }
 0x12c   :  { %v177_v28 = vpop.f32.mrb[2].mxu0 }
 0x12d   :  { %v180_v29 = vmax.f32 %v175_v26, 0.0  ;;  %v486_v30 = vpop.f32.mrb[3].mxu0 }
 0x12f   :  { %v181_v31 = vpack.c.bf16 %v180_v29, %v180_v29 }
 0x131   :  { %504 = vmatmul.mubr.bf16.vlgmr.msra.gmra.mrb[0].mxu1 %v181_v31 }
 0x204   :  { %v287_v35 = vpop.f32.mrb[0].mxu1 }
 0x205   :  { %v288_v36 = vadd.f32 %v422_v34, %v287_v35  ;;  %v505_v37 = vpop.f32.mrb[1].mxu1 }
 0x206   :  { %v290_v38 = vpop.f32.mrb[2].mxu1 }
 0x207   :  { %v293_v39 = vmax.f32 %v288_v36, 0.0  ;;  %v506_v40 = vpop.f32.mrb[3].mxu1 }
 0x209   :  { %v294_v41 = vpack.c.bf16 %v293_v39, %v293_v39 }
 0x20b   :  { %524 = vmatmul.mubr.bf16.vlgmr.msra.gmra.mrb[4].mxu0 %v294_v41 }
 0x2de   :  { %v400_v43 = vpop.f32.mrb[4].mxu0 }
 0x2df   :  { %v401_v44 = vadd.f32 %v431_v42, %v400_v43  ;;  %v525_v45 = vpop.f32.mrb[5].mxu0 }
 0x2e0   :  { %v403_v46 = vpop.f32.mrb[6].mxu0 }
 0x2e1   :  { %406 = vst [vmem:[%s779_s7] sm:$0xff] %v401_v44  ;;  %v526_v47 = vpop.f32.mrb[7].mxu0 }
 0x2e2   :  { %411 = vsyncpa [#allocation3], 1 }
 0x2e3   :  { %412 = vsyncpa [#allocation5], 1 }

// kernel: mlp_forward.1
= control target key start
LH: loop header
LB: loop body
LE: loop exit
PB: predicated region body
PF: predicated region fallthrough
CT: control target
= control target key end

     0   :  { %12 = vsyncpa [#allocation3], 0  ;;  %s772_s0 = inlined_call_operand.vmem [shape: bf16[8,128], index: 0, kind: input, shape index: {}]   ;;  %s773_s1 = inlined_call_operand.hbm [shape: bf16[128,128], index: 1, kind: input, shape index: {}]   ;;  %s774_s2 = inlined_call_operand.vmem [shape: f32[1,128], index: 2, kind: input, shape index: {}]   ;;  %s775_s3 = inlined_call_operand.hbm [shape: bf16[128,128], index: 3, kind: input, shape index: {}]   ;;  %s776_s4 = inlined_call_operand.vmem [shape: f32[1,128], index: 4, kind: input, shape index: {}]   ;;  %s777_s5 = inlined_call_operand.hbm [shape: bf16[128,128], index: 5, kind: input, shape index: {}]   ;;  %s778_s6 = inlined_call_operand.vmem [shape: f32[1,128], index: 6, kind: input, shape index: {}]   ;;  %s779_s7 = inlined_call_operand.vmem [shape: f32[8,128], index: 7, kind: output, shape index: {}]  }
   0x1   :  { %13 = vsyncpa [#allocation5], 0  ;;  %s628_s24 = smov [#allocation4]   ;;  %s629_s26 = smov [#allocation2]  }
   0x2   :  { %s35_s25 = sshll.u32 %s628_s24, 4  ;;  %s21_s27 = sshll.u32 %s629_s26, 4  ;;  %s36_s25 = int_to_ptr.vmem [resolvable:$true] %s35_s25  ;;  %s675_s27 = int_to_ptr.vmem [resolvable:$true] %s21_s27 }
   0x3   :  { %s558_s30 = scalar_lea.hbm %s775_s3, 1024 }
   0x4   :  { %p559_p0 = scmp.ne.s32.totalorder %s775_s3, %s558_s30  ;;  %p562_p1 = scmp.lt.u32.totalorder %s558_s30, %s775_s3 }
   0x6   :  { %p564_p2 = pnand %p562_p1, %p559_p0 }
   0x8   :  { %567 = shalt.err (!%p564_p2)
}
   0x9   :  { %s568_s12 = scalar_lea.vmem %s36_s25, 1024  ;;  %p573_p4 = scmp.lt.s32.totalorder %s36_s25, %s36_s25 }
   0xa   :  { %p569_p3 = scmp.ne.s32.totalorder %s36_s25, %s568_s12  ;;  %p574_p5 = scmp.lt.s32.totalorder %s568_s12, %s568_s12 }
   0xc   :  { %p575_p6 = por %p574_p5, %p573_p4 }
   0xe   :  { %p576_p7 = pnand %p575_p6, %p569_p3 }
  0x10   :  { %579 = shalt.err (!%p576_p7)
}
  0x11   :  { %s630_s13 = smov 64   ;;  %s631_s14 = smov 4  }
  0x12   :  { %41 = dma.hbm_to_vmem [thread:$0]  %s775_s3, 1024, %s36_s25, [#allocation5], %s630_s13, %s630_s13, %s631_s14  }
  0x13   :  { %s580_s19 = scalar_lea.hbm %s773_s1, 1024 }
  0x14   :  { %p581_p8 = scmp.ne.s32.totalorder %s773_s1, %s580_s19  ;;  %p584_p9 = scmp.lt.u32.totalorder %s580_s19, %s773_s1 }
  0x16   :  { %p586_p10 = pnand %p584_p9, %p581_p8 }
  0x18   :  { %589 = shalt.err (!%p586_p10)
}
  0x19   :  { %s590_s24 = scalar_lea.vmem %s675_s27, 1024  ;;  %p595_p12 = scmp.lt.s32.totalorder %s675_s27, %s675_s27 }
  0x1a   :  { %p591_p11 = scmp.ne.s32.totalorder %s675_s27, %s590_s24  ;;  %p596_p13 = scmp.lt.s32.totalorder %s590_s24, %s590_s24 }
  0x1c   :  { %p597_p0 = por %p596_p13, %p595_p12 }
  0x1e   :  { %p598_p1 = pnand %p597_p0, %p591_p11 }
  0x20   :  { %601 = shalt.err (!%p598_p1)
}
  0x21   :  { %27 = dma.hbm_to_vmem [thread:$0]  %s773_s1, 1024, %s675_s27, [#allocation3], %s630_s13, %s630_s13, %s631_s14  }
  0x22   :  { %s632_s26 = smov [#allocation6]   ;;  %s602_s8 = scalar_lea.hbm %s777_s5, 1024 }
  0x23   :  { %s49_s28 = sshll.u32 %s632_s26, 4  ;;  %p603_p2 = scmp.ne.s32.totalorder %s777_s5, %s602_s8  ;;  %s50_s28 = int_to_ptr.vmem [resolvable:$true] %s49_s28 }
  0x24   :  { %p606_p3 = scmp.lt.u32.totalorder %s602_s8, %s777_s5 }
  0x26   :  { %p608_p4 = pnand %p606_p3, %p603_p2 }
  0x28   :  { %611 = shalt.err (!%p608_p4)
}
  0x29   :  { %s612_s15 = scalar_lea.vmem %s50_s28, 1024  ;;  %p617_p6 = scmp.lt.s32.totalorder %s50_s28, %s50_s28 }
  0x2a   :  { %p613_p5 = scmp.ne.s32.totalorder %s50_s28, %s612_s15  ;;  %p618_p7 = scmp.lt.s32.totalorder %s612_s15, %s612_s15 }
  0x2c   :  { %p619_p8 = por %p618_p7, %p617_p6 }
  0x2e   :  { %p620_p9 = pnand %p619_p8, %p613_p5 }
  0x30   :  { %623 = shalt.err (!%p620_p9)
}
  0x31   :  { %55 = dma.hbm_to_vmem [thread:$0]  %s777_s5, 1024, %s50_s28, [#allocation5], %s630_s13, %s630_s13, %s631_s14  }
  0x32   :  { %624 = dma.done.wait [#allocation3], 1024  }
  0x33   :  { %625 = vsyncadd [#allocation3], 4294966272 }
  0x34   :  { %626 = dma.done.wait [#allocation5], 2048  }
  0x35   :  { %627 = vsyncadd [#allocation5], 4294965248  ;;  %v633_v0 = vmov 0.0   ;;  %vm634_vm0 = vmmov 0   ;;  %v534_v1 = vld [vmem:[#allocation2] sm:$0xff]   ;;  %v535_v2 = vld [vmem:[#allocation2 + $0x8] sm:$0xff]  }
  0x36   :  { %467 = vmatprep.subr.bf16.mxu0 %v633_v0  ;;  %483 = vmatprep.mubr.msk.bf16.mxu0 %vm634_vm0, %v633_v0  ;;  %v536_v3 = vld [vmem:[#allocation2 + $0x10] sm:$0xff]   ;;  %v542_v4 = vld [vmem:[#allocation4] sm:$0xff]   ;;  %v537_v5 = vld [vmem:[#allocation2 + $0x18] sm:$0xff]  }
  0x37   :  { %487 = vmatprep.subr.bf16.mxu1 %v633_v0  ;;  %503 = vmatprep.mubr.msk.bf16.mxu1 %vm634_vm0, %v633_v0  ;;  %v543_v6 = vld [vmem:[#allocation4 + $0x8] sm:$0xff]   ;;  %v538_v7 = vld [vmem:[#allocation2 + $0x20] sm:$0xff]   ;;  %v544_v8 = vld [vmem:[#allocation4 + $0x10] sm:$0xff]  }
  0x38   :  { %468 = vmatpush3.bf16.msra.mxu0 %v534_v1  ;;  %488 = vmatpush3.bf16.msra.mxu1 %v542_v4  ;;  %v539_v9 = vld [vmem:[#allocation2 + $0x28] sm:$0xff]   ;;  %v545_v10 = vld [vmem:[#allocation4 + $0x18] sm:$0xff]   ;;  %v540_v11 = vld [vmem:[#allocation2 + $0x30] sm:$0xff]  }
  0x39   :  { %469 = vmatprep.subr.bf16.mxu0 %v633_v0  ;;  %489 = vmatprep.subr.bf16.mxu1 %v633_v0  ;;  %v546_v12 = vld [vmem:[#allocation4 + $0x20] sm:$0xff]   ;;  %v541_v13 = vld [vmem:[#allocation2 + $0x38] sm:$0xff]   ;;  %v547_v14 = vld [vmem:[#allocation4 + $0x28] sm:$0xff]  }
  0x3a   :  { %v68_v15 = vld [vmem:[%s772_s0] sm:$0xf]  ;;  %v548_v16 = vld [vmem:[#allocation4 + $0x30] sm:$0xff]   ;;  %v549_v17 = vld [vmem:[#allocation4 + $0x38] sm:$0xff]  }
  0x3b   :  { %v550_v18 = vld [vmem:[#allocation6] sm:$0xff]   ;;  %v551_v19 = vld [vmem:[#allocation6 + $0x8] sm:$0xff]   ;;  %v552_v20 = vld [vmem:[#allocation6 + $0x10] sm:$0xff]  }
  0x3c   :  { %470 = vmatpush3.bf16.msra.mxu0 %v535_v2  ;;  %490 = vmatpush3.bf16.msra.mxu1 %v543_v6  ;;  %v553_v21 = vld [vmem:[#allocation6 + $0x18] sm:$0xff]   ;;  %v554_v22 = vld [vmem:[#allocation6 + $0x20] sm:$0xff]   ;;  %v555_v23 = vld [vmem:[#allocation6 + $0x28] sm:$0xff]  }
  0x3d   :  { %471 = vmatprep.subr.bf16.mxu0 %v633_v0  ;;  %491 = vmatprep.subr.bf16.mxu1 %v633_v0  ;;  %v413_v24 = vld [vmem:[%s774_s2] ss:$0 sm:$0xff]  ;;  %v556_v32 = vld [vmem:[#allocation6 + $0x30] sm:$0xff]   ;;  %v557_v33 = vld [vmem:[#allocation6 + $0x38] sm:$0xff]  }
  0x3e   :  { %v422_v34 = vld [vmem:[%s776_s4] ss:$0 sm:$0xff] }
  0x3f   :  { %v431_v42 = vld [vmem:[%s778_s6] ss:$0 sm:$0xff] }
  0x40   :  { %472 = vmatpush3.bf16.msra.mxu0 %v536_v3  ;;  %492 = vmatpush3.bf16.msra.mxu1 %v544_v8 }
  0x41   :  { %473 = vmatprep.subr.bf16.mxu0 %v633_v0  ;;  %493 = vmatprep.subr.bf16.mxu1 %v633_v0 }
  0x44   :  { %474 = vmatpush3.bf16.msra.mxu0 %v537_v5  ;;  %494 = vmatpush3.bf16.msra.mxu1 %v545_v10 }
  0x45   :  { %475 = vmatprep.subr.bf16.mxu0 %v633_v0  ;;  %495 = vmatprep.subr.bf16.mxu1 %v633_v0 }
  0x48   :  { %476 = vmatpush3.bf16.msra.mxu0 %v538_v7  ;;  %496 = vmatpush3.bf16.msra.mxu1 %v546_v12 }
  0x49   :  { %477 = vmatprep.subr.bf16.mxu0 %v633_v0  ;;  %497 = vmatprep.subr.bf16.mxu1 %v633_v0 }
  0x4c   :  { %478 = vmatpush3.bf16.msra.mxu0 %v539_v9  ;;  %498 = vmatpush3.bf16.msra.mxu1 %v547_v14 }
  0x4d   :  { %479 = vmatprep.subr.bf16.mxu0 %v633_v0  ;;  %499 = vmatprep.subr.bf16.mxu1 %v633_v0 }
  0x50   :  { %480 = vmatpush3.bf16.msra.mxu0 %v540_v11  ;;  %500 = vmatpush3.bf16.msra.mxu1 %v548_v16 }
  0x51   :  { %481 = vmatprep.subr.bf16.mxu0 %v633_v0  ;;  %501 = vmatprep.subr.bf16.mxu1 %v633_v0 }
  0x54   :  { %482 = vmatpush3.bf16.msra.mxu0 %v541_v13  ;;  %502 = vmatpush3.bf16.msra.mxu1 %v549_v17 }
  0x55   :  { %507 = vmatprep.subr.bf16.mxu0 %v633_v0 }
  0x57   :  { %484 = vmatmul.mubr.bf16.vlgmr.msra.gmra.mrb[0].mxu0 %v68_v15 }
  0x58   :  { %523 = vmatprep.mubr.msk.bf16.mxu0 %vm634_vm0, %v633_v0  ;;  %508 = vmatpush3.bf16.msra.mxu0 %v550_v18 }
  0x59   :  { %509 = vmatprep.subr.bf16.mxu0 %v633_v0 }
  0x5c   :  { %510 = vmatpush3.bf16.msra.mxu0 %v551_v19 }
  0x5d   :  { %511 = vmatprep.subr.bf16.mxu0 %v633_v0 }
  0x60   :  { %512 = vmatpush3.bf16.msra.mxu0 %v552_v20 }
  0x61   :  { %513 = vmatprep.subr.bf16.mxu0 %v633_v0 }
  0x64   :  { %514 = vmatpush3.bf16.msra.mxu0 %v553_v21 }
  0x65   :  { %515 = vmatprep.subr.bf16.mxu0 %v633_v0 }
  0x68   :  { %516 = vmatpush3.bf16.msra.mxu0 %v554_v22 }
  0x69   :  { %517 = vmatprep.subr.bf16.mxu0 %v633_v0 }
  0x6c   :  { %518 = vmatpush3.bf16.msra.mxu0 %v555_v23 }
  0x6d   :  { %519 = vmatprep.subr.bf16.mxu0 %v633_v0 }
  0x70   :  { %520 = vmatpush3.bf16.msra.mxu0 %v556_v32 }
  0x71   :  { %521 = vmatprep.subr.bf16.mxu0 %v633_v0 }
  0x74   :  { %522 = vmatpush3.bf16.msra.mxu0 %v557_v33 }
 0x12a   :  { %v174_v25 = vpop.f32.mrb[0].mxu0 }
 0x12b   :  { %v175_v26 = vadd.f32 %v413_v24, %v174_v25  ;;  %v485_v27 = vpop.f32.mrb[1].mxu0 }
 0x12c   :  { %v177_v28 = vpop.f32.mrb[2].mxu0 }
 0x12d   :  { %v180_v29 = vmax.f32 %v175_v26, 0.0  ;;  %v486_v30 = vpop.f32.mrb[3].mxu0 }
 0x12f   :  { %v181_v31 = vpack.c.bf16 %v180_v29, %v180_v29 }
 0x131   :  { %504 = vmatmul.mubr.bf16.vlgmr.msra.gmra.mrb[0].mxu1 %v181_v31 }
 0x204   :  { %v287_v35 = vpop.f32.mrb[0].mxu1 }
 0x205   :  { %v288_v36 = vadd.f32 %v422_v34, %v287_v35  ;;  %v505_v37 = vpop.f32.mrb[1].mxu1 }
 0x206   :  { %v290_v38 = vpop.f32.mrb[2].mxu1 }
 0x207   :  { %v293_v39 = vmax.f32 %v288_v36, 0.0  ;;  %v506_v40 = vpop.f32.mrb[3].mxu1 }
 0x209   :  { %v294_v41 = vpack.c.bf16 %v293_v39, %v293_v39 }
 0x20b   :  { %524 = vmatmul.mubr.bf16.vlgmr.msra.gmra.mrb[4].mxu0 %v294_v41 }
 0x2de   :  { %v400_v43 = vpop.f32.mrb[4].mxu0 }
 0x2df   :  { %v401_v44 = vadd.f32 %v431_v42, %v400_v43  ;;  %v525_v45 = vpop.f32.mrb[5].mxu0 }
 0x2e0   :  { %v403_v46 = vpop.f32.mrb[6].mxu0 }
 0x2e1   :  { %406 = vst [vmem:[%s779_s7] sm:$0xff] %v401_v44  ;;  %v526_v47 = vpop.f32.mrb[7].mxu0 }
 0x2e2   :  { %411 = vsyncpa [#allocation3], 1 }
 0x2e3   :  { %412 = vsyncpa [#allocation5], 1 }

</bundles_post_ra>
